<compile_context>
chip_gen: v5e
topology: v5e:2x2
jax: 0.10.0
libtpu: 0.0.40
codegen_flags: <defaults>
</compile_context>

<pallas_src>
import jax
import jax.numpy as jnp
from jax.experimental import pallas as pl
from jax.experimental.pallas import tpu as pltpu

F_PAD = 128          # lane width (all layer widths <= 128)
EPS_BN = 1e-5        # nn.BatchNorm1d default eps
EPS_L2 = 1e-12       # F.normalize default eps


def _make_kernel(dims):
    """dims = (d_in, d_h1, d_h2, d_out), all contraction dims multiples of 8."""
    d_in, d_h1, d_h2, _ = dims
    r1, r2, r3 = 0, d_in, d_in + d_h1           # row offsets into the weight slab

    def kernel(x_ref, w_ref, vp_ref, o_ref):
        # x_ref : (Bg, d_in) f32          current batch group (unpadded lanes)
        # w_ref : (d_in+d_h1+d_h2, 128)   stacked W1/W2/W3, lane-padded columns
        # vp_ref: (8, 128) packed rows [g1, be1, g2, be2, b3, ge, bee, 0]
        # o_ref : (Bg, 128) f32           valid output in the first 2*out_dim lanes

        def bn_train(h, gamma, beta):
            # training-mode BatchNorm1d: batch mean, biased batch variance,
            # scale/shift form (2 VPU ops per element), rsqrt on the EUP slot.
            mean = jnp.mean(h, axis=0, keepdims=True)
            var = jnp.maximum(jnp.mean(h * h, axis=0, keepdims=True) - mean * mean, 0.0)
            scale = gamma * jax.lax.rsqrt(var + EPS_BN)
            shift = beta - mean * scale
            return h * scale + shift

        vp = vp_ref[...]
        g1, be1 = vp[0:1], vp[1:2]
        g2, be2 = vp[2:3], vp[3:4]
        b3 = vp[4:5]
        ge, bee = vp[5:6], vp[6:7]

        # hidden layer 1: Linear -> BN -> ReLU (Linear bias omitted: cancels
        # against the batch-mean subtraction of train-mode BN; dropout p=0).
        x = x_ref[...]
        h = jnp.dot(x, w_ref[r1:r2, :], preferred_element_type=jnp.float32)
        h = jnp.maximum(bn_train(h, g1, be1), 0.0)

        # hidden layer 2: Linear -> BN -> ReLU (valid lanes of h are [:d_h1];
        # padded lanes are exactly zero so the slice carries all information).
        h = jnp.dot(h[:, :d_h1], w_ref[r2:r3, :], preferred_element_type=jnp.float32)
        h = jnp.maximum(bn_train(h, g2, be2), 0.0)

        # output 'Linear_layer' (bias kept: no BN directly after it)
        y = jnp.dot(h[:, :d_h2], w_ref[r3:r3 + d_h2, :],
                    preferred_element_type=jnp.float32) + b3

        # out_scaling == 'L2' -> F.normalize(out, dim=-1). Padded lanes are
        # zero so they do not perturb the norm; rsqrt + mul replaces sqrt + div
        # (identical to x / max(||x||, eps)).
        sumsq = jnp.sum(y * y, axis=-1, keepdims=True)
        y = y * jax.lax.rsqrt(jnp.maximum(sumsq, EPS_L2 * EPS_L2))

        # extra_batch = BatchNorm1d(2*out_dim); full-tile lane-dense store.
        o_ref[...] = bn_train(y, ge, bee)

    return kernel


def make_params(key, in_dim, hidden_dims, out_dim, f_pad=F_PAD):
    """Deterministic PyTorch-like init, packed into two compact slabs."""
    assert len(hidden_dims) == 2, "kernel is specialized to 2 hidden layers"
    d_in = 2 * in_dim
    d_h = [2 * h for h in hidden_dims]
    d_out = 2 * out_dim
    dims = (d_in, d_h[0], d_h[1], d_out)
    assert max(dims) <= f_pad
    for d in dims[:-1]:
        assert d % 8 == 0, "contraction dims must be sublane-aligned"

    keys = jax.random.split(key, 4)

    # hidden Linear weights (biases dropped: algebraically cancelled by BN)
    full = [d_in] + d_h + [d_out]
    rows = []
    for li in range(2):
        fi, fo = full[li], full[li + 1]
        bound = 1.0 / (fi ** 0.5)
        w = jax.random.uniform(keys[li], (fi, fo), jnp.float32, -bound, bound)
        rows.append(jnp.zeros((fi, f_pad), jnp.float32).at[:, :fo].set(w))

    # final Linear_layer (bias=True)
    fi, fo = full[-2], full[-1]
    bound = 1.0 / (fi ** 0.5)
    w3 = jax.random.uniform(keys[2], (fi, fo), jnp.float32, -bound, bound)
    b3 = jax.random.uniform(keys[3], (fo,), jnp.float32, -bound, bound)
    rows.append(jnp.zeros((fi, f_pad), jnp.float32).at[:, :fo].set(w3))

    # compact weight slab: rows [0:d_in] = W1, [d_in:d_in+d_h1] = W2, rest = W3
    w_slab = jnp.concatenate(rows, axis=0)            # (d_in+d_h1+d_h2, f_pad)

    def row(vec, n):
        return jnp.zeros((f_pad,), jnp.float32).at[:n].set(vec)

    vec_stack = jnp.stack([
        row(jnp.ones((d_h[0],), jnp.float32), d_h[0]),   # g1
        row(jnp.zeros((d_h[0],), jnp.float32), d_h[0]),  # be1
        row(jnp.ones((d_h[1],), jnp.float32), d_h[1]),   # g2
        row(jnp.zeros((d_h[1],), jnp.float32), d_h[1]),  # be2
        row(b3, fo),                                     # b3
        row(jnp.ones((d_out,), jnp.float32), d_out),     # extra_batch gamma
        row(jnp.zeros((d_out,), jnp.float32), d_out),    # extra_batch beta
        jnp.zeros((f_pad,), jnp.float32),                # pad to 8 sublanes
    ])                                                   # (8, f_pad)
    return {"w": w_slab, "vec": vec_stack, "dims": dims}


def fc_net_extra_forward_stacked(x_groups, params):
    """x_groups: (G, B, 2*in_dim) — G independent batches (one module forward
    each). Grid over G; weights stay VMEM-resident via constant index_maps."""
    w_slab, vec_stack, dims = params["w"], params["vec"], params["dims"]
    d_in, d_h1, d_h2, d_out = dims
    G, Bg, f_in = x_groups.shape
    assert f_in == d_in
    w_rows = w_slab.shape[0]

    kernel = _make_kernel(dims)

    cost = pl.CostEstimate(
        flops=2 * G * Bg * (d_in + d_h1 + d_h2) * F_PAD,
        transcendentals=G * (3 * F_PAD + Bg),
        bytes_accessed=4 * (w_slab.size + vec_stack.size
                            + G * Bg * d_in + G * Bg * F_PAD),
    )

    out_pad = pl.pallas_call(
        kernel,
        out_shape=jax.ShapeDtypeStruct((G, Bg, F_PAD), jnp.float32),
        grid_spec=pltpu.PrefetchScalarGridSpec(
            num_scalar_prefetch=0,
            grid=(G,),
            in_specs=[
                # per-group x tile (unpadded last dim == full array dim)
                pl.BlockSpec((None, Bg, d_in), lambda g: (g, 0, 0)),
                # weights / packed vectors: constant block index => fetched once
                pl.BlockSpec((w_rows, F_PAD), lambda g: (0, 0)),
                pl.BlockSpec((8, F_PAD), lambda g: (0, 0)),
            ],
            out_specs=pl.BlockSpec((None, Bg, F_PAD), lambda g: (g, 0, 0)),
        ),
        compiler_params=pltpu.CompilerParams(
            dimension_semantics=("parallel",)),     # v7x: shard groups over 2 TCs
        cost_estimate=cost,
    )(x_groups.astype(jnp.float32), w_slab, vec_stack)
    return out_pad[..., :d_out]


def fc_net_extra_forward(x, params):
    """Single-batch path matching the PyTorch module call on x of shape
    (B, 1, 2*in_dim) (or (B, 2*in_dim))."""
    x2d = jnp.squeeze(x, axis=1) if (x.ndim == 3 and x.shape[1] == 1) else x
    return fc_net_extra_forward_stacked(x2d[None], params)[0]


if __name__ == "__main__":
    # module config: fc_net_extra(in_dim=8, hidden_dims=[16,16], out_dim=4)
    in_dim, hidden_dims, out_dim = 8, (16, 16), 4
    B = 8

    key = jax.random.PRNGKey(0)
    k_x, k_p = jax.random.split(key)
    params = make_params(k_p, in_dim, hidden_dims, out_dim)

    # single PyTorch-shaped batch (B, 1, 2*in_dim)
    x = jax.random.normal(k_x, (B, 1, 2 * in_dim), jnp.float32)
    out = jax.block_until_ready(fc_net_extra_forward(x, params))
    assert out.shape == (B, 2 * out_dim)
    assert bool(jnp.all(jnp.isfinite(out)))

    # stacked independent batches exercising the grid (weights VMEM-resident,
    # grid axis "parallel" for v7x's two TensorCores)
    G = 4
    xg = jax.random.normal(k_x, (G, B, 2 * in_dim), jnp.float32)
    outg = jax.block_until_ready(fc_net_extra_forward_stacked(xg, params))
    assert outg.shape == (G, B, 2 * out_dim)
    assert bool(jnp.all(jnp.isfinite(outg)))

    print("KERNEL_OK")
</pallas_src>

<mosaic_0001>
module attributes {stable_mosaic.version = 11 : i64} {
  func.func @kernel(%arg0: i32, %arg1: memref<1x8x16xf32, #tpu.memory_space<vmem>>, %arg2: memref<80x128xf32, #tpu.memory_space<vmem>>, %arg3: memref<8x128xf32, #tpu.memory_space<vmem>>, %arg4: memref<1x8x128xf32, #tpu.memory_space<vmem>>) attributes {dimension_semantics = [#tpu.dimension_semantics<parallel>], iteration_bounds = array<i64: 1>, scalar_prefetch = 0 : i64, scratch_operands = 0 : i64, tpu.core_type = #tpu.core_type<tc>, window_params = [{transform_indices = @transform_0, window_bounds = array<i64: 1, 8, 16>}, {pipeline_mode = #tpu.pipeline_mode<synchronous>, transform_indices = @transform_1, window_bounds = array<i64: 80, 128>}, {pipeline_mode = #tpu.pipeline_mode<synchronous>, transform_indices = @transform_2, window_bounds = array<i64: 8, 128>}, {transform_indices = @transform_3, window_bounds = array<i64: 1, 8, 128>}]} {
    %c0 = arith.constant 0 : index
    %c0_0 = arith.constant 0 : index
    %0 = vector.load %arg3[%c0, %c0_0] : memref<8x128xf32, #tpu.memory_space<vmem>>, vector<8x128xf32>
    %1 = vector.extract_strided_slice %0 {offsets = [0, 0], sizes = [1, 128], strides = [1, 1]} : vector<8x128xf32> to vector<1x128xf32>
    %2 = vector.extract_strided_slice %0 {offsets = [1, 0], sizes = [1, 128], strides = [1, 1]} : vector<8x128xf32> to vector<1x128xf32>
    %3 = vector.extract_strided_slice %0 {offsets = [2, 0], sizes = [1, 128], strides = [1, 1]} : vector<8x128xf32> to vector<1x128xf32>
    %4 = vector.extract_strided_slice %0 {offsets = [3, 0], sizes = [1, 128], strides = [1, 1]} : vector<8x128xf32> to vector<1x128xf32>
    %5 = vector.extract_strided_slice %0 {offsets = [4, 0], sizes = [1, 128], strides = [1, 1]} : vector<8x128xf32> to vector<1x128xf32>
    %6 = vector.extract_strided_slice %0 {offsets = [5, 0], sizes = [1, 128], strides = [1, 1]} : vector<8x128xf32> to vector<1x128xf32>
    %7 = vector.extract_strided_slice %0 {offsets = [6, 0], sizes = [1, 128], strides = [1, 1]} : vector<8x128xf32> to vector<1x128xf32>
    %c0_1 = arith.constant 0 : index
    %c0_2 = arith.constant 0 : index
    %c0_3 = arith.constant 0 : index
    %8 = vector.load %arg1[%c0_1, %c0_2, %c0_3] : memref<1x8x16xf32, #tpu.memory_space<vmem>>, vector<1x8x16xf32>
    %9 = vector.shape_cast %8 : vector<1x8x16xf32> to vector<8x16xf32>
    %c0_4 = arith.constant 0 : index
    %c0_5 = arith.constant 0 : index
    %10 = vector.load %arg2[%c0_4, %c0_5] : memref<80x128xf32, #tpu.memory_space<vmem>>, vector<16x128xf32>
    %cst = arith.constant dense<0.000000e+00> : vector<8x128xf32>
    %11 = tpu.matmul %9, %10, %cst {dimension_numbers = #tpu.dot_dimension_numbers<[1], [0], [0], [1], [0, 0, 1, 1], [], []>} : vector<8x16xf32>, vector<16x128xf32>, vector<8x128xf32> -> vector<8x128xf32>
    %cst_6 = arith.constant dense<0.000000e+00> : vector<128xf32>
    %12 = vector.multi_reduction <add>, %11, %cst_6 [0] : vector<8x128xf32> to vector<128xf32>
    %13 = vector.shape_cast %12 : vector<128xf32> to vector<1x128xf32>
    %cst_7 = arith.constant 8.000000e+00 : f32
    %14 = vector.broadcast %cst_7 : f32 to vector<1x128xf32>
    %15 = arith.divf %13, %14 : vector<1x128xf32>
    %16 = arith.mulf %11, %11 : vector<8x128xf32>
    %cst_8 = arith.constant dense<0.000000e+00> : vector<128xf32>
    %17 = vector.multi_reduction <add>, %16, %cst_8 [0] : vector<8x128xf32> to vector<128xf32>
    %18 = vector.shape_cast %17 : vector<128xf32> to vector<1x128xf32>
    %cst_9 = arith.constant 8.000000e+00 : f32
    %19 = vector.broadcast %cst_9 : f32 to vector<1x128xf32>
    %20 = arith.divf %18, %19 : vector<1x128xf32>
    %21 = arith.mulf %15, %15 : vector<1x128xf32>
    %22 = arith.subf %20, %21 : vector<1x128xf32>
    %cst_10 = arith.constant 0.000000e+00 : f32
    %23 = vector.broadcast %cst_10 : f32 to vector<1x128xf32>
    %24 = arith.maximumf %22, %23 : vector<1x128xf32>
    %cst_11 = arith.constant 9.99999974E-6 : f32
    %25 = vector.broadcast %cst_11 : f32 to vector<1x128xf32>
    %26 = arith.addf %24, %25 : vector<1x128xf32>
    %27 = math.rsqrt %26 : vector<1x128xf32>
    %28 = arith.mulf %1, %27 : vector<1x128xf32>
    %29 = arith.mulf %15, %28 : vector<1x128xf32>
    %30 = arith.subf %2, %29 : vector<1x128xf32>
    %31 = vector.broadcast %28 : vector<1x128xf32> to vector<8x128xf32>
    %32 = arith.mulf %11, %31 : vector<8x128xf32>
    %33 = vector.broadcast %30 : vector<1x128xf32> to vector<8x128xf32>
    %34 = arith.addf %32, %33 : vector<8x128xf32>
    %cst_12 = arith.constant 0.000000e+00 : f32
    %35 = vector.broadcast %cst_12 : f32 to vector<8x128xf32>
    %36 = arith.maximumf %34, %35 : vector<8x128xf32>
    %37 = vector.extract_strided_slice %36 {offsets = [0, 0], sizes = [8, 32], strides = [1, 1]} : vector<8x128xf32> to vector<8x32xf32>
    %c16 = arith.constant 16 : index
    %c0_13 = arith.constant 0 : index
    %38 = vector.load %arg2[%c16, %c0_13] : memref<80x128xf32, #tpu.memory_space<vmem>>, vector<32x128xf32>
    %cst_14 = arith.constant dense<0.000000e+00> : vector<8x128xf32>
    %39 = tpu.matmul %37, %38, %cst_14 {dimension_numbers = #tpu.dot_dimension_numbers<[1], [0], [0], [1], [0, 0, 1, 1], [], []>} : vector<8x32xf32>, vector<32x128xf32>, vector<8x128xf32> -> vector<8x128xf32>
    %cst_15 = arith.constant dense<0.000000e+00> : vector<128xf32>
    %40 = vector.multi_reduction <add>, %39, %cst_15 [0] : vector<8x128xf32> to vector<128xf32>
    %41 = vector.shape_cast %40 : vector<128xf32> to vector<1x128xf32>
    %cst_16 = arith.constant 8.000000e+00 : f32
    %42 = vector.broadcast %cst_16 : f32 to vector<1x128xf32>
    %43 = arith.divf %41, %42 : vector<1x128xf32>
    %44 = arith.mulf %39, %39 : vector<8x128xf32>
    %cst_17 = arith.constant dense<0.000000e+00> : vector<128xf32>
    %45 = vector.multi_reduction <add>, %44, %cst_17 [0] : vector<8x128xf32> to vector<128xf32>
    %46 = vector.shape_cast %45 : vector<128xf32> to vector<1x128xf32>
    %cst_18 = arith.constant 8.000000e+00 : f32
    %47 = vector.broadcast %cst_18 : f32 to vector<1x128xf32>
    %48 = arith.divf %46, %47 : vector<1x128xf32>
    %49 = arith.mulf %43, %43 : vector<1x128xf32>
    %50 = arith.subf %48, %49 : vector<1x128xf32>
    %cst_19 = arith.constant 0.000000e+00 : f32
    %51 = vector.broadcast %cst_19 : f32 to vector<1x128xf32>
    %52 = arith.maximumf %50, %51 : vector<1x128xf32>
    %cst_20 = arith.constant 9.99999974E-6 : f32
    %53 = vector.broadcast %cst_20 : f32 to vector<1x128xf32>
    %54 = arith.addf %52, %53 : vector<1x128xf32>
    %55 = math.rsqrt %54 : vector<1x128xf32>
    %56 = arith.mulf %3, %55 : vector<1x128xf32>
    %57 = arith.mulf %43, %56 : vector<1x128xf32>
    %58 = arith.subf %4, %57 : vector<1x128xf32>
    %59 = vector.broadcast %56 : vector<1x128xf32> to vector<8x128xf32>
    %60 = arith.mulf %39, %59 : vector<8x128xf32>
    %61 = vector.broadcast %58 : vector<1x128xf32> to vector<8x128xf32>
    %62 = arith.addf %60, %61 : vector<8x128xf32>
    %cst_21 = arith.constant 0.000000e+00 : f32
    %63 = vector.broadcast %cst_21 : f32 to vector<8x128xf32>
    %64 = arith.maximumf %62, %63 : vector<8x128xf32>
    %65 = vector.extract_strided_slice %64 {offsets = [0, 0], sizes = [8, 32], strides = [1, 1]} : vector<8x128xf32> to vector<8x32xf32>
    %c48 = arith.constant 48 : index
    %c0_22 = arith.constant 0 : index
    %66 = vector.load %arg2[%c48, %c0_22] : memref<80x128xf32, #tpu.memory_space<vmem>>, vector<32x128xf32>
    %cst_23 = arith.constant dense<0.000000e+00> : vector<8x128xf32>
    %67 = tpu.matmul %65, %66, %cst_23 {dimension_numbers = #tpu.dot_dimension_numbers<[1], [0], [0], [1], [0, 0, 1, 1], [], []>} : vector<8x32xf32>, vector<32x128xf32>, vector<8x128xf32> -> vector<8x128xf32>
    %68 = vector.broadcast %5 : vector<1x128xf32> to vector<8x128xf32>
    %69 = arith.addf %67, %68 : vector<8x128xf32>
    %70 = arith.mulf %69, %69 : vector<8x128xf32>
    %cst_24 = arith.constant dense<0.000000e+00> : vector<8xf32>
    %71 = vector.multi_reduction <add>, %70, %cst_24 [1] : vector<8x128xf32> to vector<8xf32>
    %72 = vector.shape_cast %71 : vector<8xf32> to vector<8x1xf32>
    %cst_25 = arith.constant 1.000000e-24 : f32
    %73 = vector.broadcast %cst_25 : f32 to vector<8x1xf32>
    %74 = arith.maximumf %72, %73 : vector<8x1xf32>
    %75 = math.rsqrt %74 : vector<8x1xf32>
    %76 = vector.broadcast %75 : vector<8x1xf32> to vector<8x128xf32>
    %77 = arith.mulf %69, %76 : vector<8x128xf32>
    %cst_26 = arith.constant dense<0.000000e+00> : vector<128xf32>
    %78 = vector.multi_reduction <add>, %77, %cst_26 [0] : vector<8x128xf32> to vector<128xf32>
    %79 = vector.shape_cast %78 : vector<128xf32> to vector<1x128xf32>
    %cst_27 = arith.constant 8.000000e+00 : f32
    %80 = vector.broadcast %cst_27 : f32 to vector<1x128xf32>
    %81 = arith.divf %79, %80 : vector<1x128xf32>
    %82 = arith.mulf %77, %77 : vector<8x128xf32>
    %cst_28 = arith.constant dense<0.000000e+00> : vector<128xf32>
    %83 = vector.multi_reduction <add>, %82, %cst_28 [0] : vector<8x128xf32> to vector<128xf32>
    %84 = vector.shape_cast %83 : vector<128xf32> to vector<1x128xf32>
    %cst_29 = arith.constant 8.000000e+00 : f32
    %85 = vector.broadcast %cst_29 : f32 to vector<1x128xf32>
    %86 = arith.divf %84, %85 : vector<1x128xf32>
    %87 = arith.mulf %81, %81 : vector<1x128xf32>
    %88 = arith.subf %86, %87 : vector<1x128xf32>
    %cst_30 = arith.constant 0.000000e+00 : f32
    %89 = vector.broadcast %cst_30 : f32 to vector<1x128xf32>
    %90 = arith.maximumf %88, %89 : vector<1x128xf32>
    %cst_31 = arith.constant 9.99999974E-6 : f32
    %91 = vector.broadcast %cst_31 : f32 to vector<1x128xf32>
    %92 = arith.addf %90, %91 : vector<1x128xf32>
    %93 = math.rsqrt %92 : vector<1x128xf32>
    %94 = arith.mulf %6, %93 : vector<1x128xf32>
    %95 = arith.mulf %81, %94 : vector<1x128xf32>
    %96 = arith.subf %7, %95 : vector<1x128xf32>
    %97 = vector.broadcast %94 : vector<1x128xf32> to vector<8x128xf32>
    %98 = arith.mulf %77, %97 : vector<8x128xf32>
    %99 = vector.broadcast %96 : vector<1x128xf32> to vector<8x128xf32>
    %100 = arith.addf %98, %99 : vector<8x128xf32>
    %c0_32 = arith.constant 0 : index
    %c0_33 = arith.constant 0 : index
    %c0_34 = arith.constant 0 : index
    %101 = vector.load %arg4[%c0_32, %c0_33, %c0_34] : memref<1x8x128xf32, #tpu.memory_space<vmem>>, vector<1x8x128xf32>
    %102 = vector.shape_cast %101 : vector<1x8x128xf32> to vector<8x128xf32>
    %103 = vector.shape_cast %100 : vector<8x128xf32> to vector<1x8x128xf32>
    tpu.vector_store %arg4[%c0_32, %c0_33, %c0_34], %103 {strides = array<i32>} : memref<1x8x128xf32, #tpu.memory_space<vmem>>, vector<1x8x128xf32>,
    return
  }
  func.func @transform_0(%arg0: i32) -> (i32, i32, i32) {
    %c0_i32 = arith.constant 0 : i32
    %c0_i32_0 = arith.constant 0 : i32
    %c0_i32_1 = arith.constant 0 : i32
    return %arg0, %c0_i32, %c0_i32_0 : i32, i32, i32
  }
  func.func @transform_1(%arg0: i32) -> (i32, i32) {
    %c0_i32 = arith.constant 0 : i32
    %c0_i32_0 = arith.constant 0 : i32
    %c0_i32_1 = arith.constant 0 : i32
    return %c0_i32, %c0_i32_0 : i32, i32
  }
  func.func @transform_2(%arg0: i32) -> (i32, i32) {
    %c0_i32 = arith.constant 0 : i32
    %c0_i32_0 = arith.constant 0 : i32
    %c0_i32_1 = arith.constant 0 : i32
    return %c0_i32, %c0_i32_0 : i32, i32
  }
  func.func @transform_3(%arg0: i32) -> (i32, i32, i32) {
    %c0_i32 = arith.constant 0 : i32
    %c0_i32_0 = arith.constant 0 : i32
    %c0_i32_1 = arith.constant 0 : i32
    return %arg0, %c0_i32, %c0_i32_0 : i32, i32, i32
  }
}

</mosaic_0001>

<bundles_post_ra>
// kernel: tpu_custom_call.1
= control target key start
LH: loop header
LB: loop body
LE: loop exit
PB: predicated region body
PF: predicated region fallthrough
CT: control target
= control target key end

     0   :  { %8 = vsyncpa [#allocation3], 0  ;;  %s482_s0 = inlined_call_operand.hbm [shape: f32[1,8,16], index: 0, kind: input, shape index: {}]   ;;  %s483_s1 = inlined_call_operand.hbm [shape: f32[80,128], index: 1, kind: input, shape index: {}]   ;;  %s484_s2 = inlined_call_operand.hbm [shape: f32[8,128], index: 2, kind: input, shape index: {}]   ;;  %s485_s3 = inlined_call_operand.hbm [shape: f32[1,8,128], index: 3, kind: output, shape index: {}]  }
   0x1   :  { %9 = vsyncpa [#allocation6], 0  ;;  %s26_s14 = sshll.u32 %s483_s1, 4  ;;  %s27_s14 = int_to_ptr.hbm [resolvable:$true] %s26_s14 }
   0x2   :  { %10 = vsyncpa [#allocation4], 0  ;;  %s424_s15 = smov [#allocation5]   ;;  %s16_s19 = sshll.u32 %s482_s0, 4  ;;  %s17_s19 = int_to_ptr.hbm [resolvable:$true] %s16_s19 }
   0x3   :  { %s28_s16 = sshll.u32 %s424_s15, 4  ;;  %s425_s20 = smov 128   ;;  %s29_s16 = int_to_ptr.vmem [resolvable:$true] %s28_s16 }
   0x4   :  { %s426_s21 = smov 8   ;;  %s427_s22 = smov [#allocation2]  }
   0x5   :  { %34 = dma.hbm_to_vmem [thread:$0]  %s27_s14, 1280, %s29_s16, [#allocation6], %s425_s20, %s425_s20, %s426_s21  }
   0x6   :  { %s18_s23 = sshll.u32 %s427_s22, 4  ;;  %s40_s26 = sshll.u32 %s484_s2, 4  ;;  %s19_s23 = int_to_ptr.vmem [resolvable:$true] %s18_s23  ;;  %s41_s26 = int_to_ptr.hbm [resolvable:$true] %s40_s26 }
   0x7   :  { %21 = dma.hbm_to_vmem [thread:$0]  %s17_s19, 128, %s19_s23, [#allocation3]  }
   0x8   :  { %s428_s1 = smov [#allocation7]  }
   0x9   :  { %s42_s27 = sshll.u32 %s428_s1, 4  ;;  %s43_s27 = int_to_ptr.vmem [resolvable:$true] %s42_s27 }
   0xa   :  { %45 = dma.hbm_to_vmem [thread:$0]  %s41_s26, 128, %s43_s27, [#allocation6]  }
   0xb   :  { %418 = dma.done.wait [#allocation3], 128  }
   0xc   :  { %419 = vsyncadd [#allocation3], 4294967168 }
   0xd   :  { %420 = dma.done.wait [#allocation6], 1408  }
   0xe   :  { %421 = vsyncadd [#allocation6], 4294965888  ;;  %v61_v0 = vld [vmem:[#allocation5 + $0x8] sm:$0xff]  ;;  %v60_v1 = vld [vmem:[#allocation5] sm:$0xff]  ;;  %vm62_vm0 = vcmask 130048   ;;  %v429_v3 = vmov 8.0  }
   0xf   :  { %80 = vmatpush.msra.mxu0 %v61_v0  ;;  %v59_v2 = vld [vmem:[#allocation2] sm:$0xff]  ;;  %312 = vrcp.f32 %v429_v3  ;;  %v136_v25 = vld [vmem:[#allocation5 + $0x28] sm:$0xff]  ;;  %v135_v26 = vld [vmem:[#allocation5 + $0x20] sm:$0xff]  ;;  %vm137_vm5 = vcmask 261120   ;;  %s430_s0 = smov [#allocation8]   ;;  %s291_s30 = sshll.u32 %s485_s3, 4  ;;  %s292_s30 = int_to_ptr.hbm [resolvable:$true] %s291_s30 }
  0x10   :  { %153 = vmatpush.msra.mxu1 %v136_v25  ;;  %v134_v29 = vld [vmem:[#allocation5 + $0x18] sm:$0xff]  ;;  %v133_v31 = vld [vmem:[#allocation5 + $0x10] sm:$0xff]  ;;  %v203_v3 = vld [vmem:[#allocation5 + $0x40] sm:$0xff]  ;;  %s289_s2 = sshll.u32 %s430_s0, 4  ;;  %s290_s2 = int_to_ptr.vmem [resolvable:$true] %s289_s2 }
  0x11   :  { %81 = vmatpush.msra.mxu0 %v60_v1  ;;  %v464_v39 = vld [vmem:[#allocation7] sm:$0xff] }
  0x12   :  { %302 = vmatmul.msk.f32.vlgmr.msra.gmra.mxu0 %vm62_vm0, %v59_v2  ;;  %154 = vmatpush.msra.mxu1 %v135_v26  ;;  %v204_v2 = vld [vmem:[#allocation5 + $0x48] sm:$0xff] }
  0x13   :  { %221 = vmatpush.msra.mxu2 %v204_v2 }
  0x14   :  { %155 = vmatpush.msra.mxu1 %v134_v29 }
  0x15   :  { %v313_v4 = vpop.eup %312  ;;  %222 = vmatpush.msra.mxu2 %v203_v3 }
  0x16   :  { %v93_v5 = vmul.f32 8.0, %v313_v4  ;;  %vm97_vm1 = vweird.f32 %v313_v4  ;;  %156 = vmatpush.msra.mxu1 %v133_v31 }
  0x18   :  { %v94_v6 = vsub.f32 1.0, %v93_v5 }
  0x1a   :  { %v95_v10 = vmul.f32 %v313_v4, %v94_v6  ;;  %v202_v6 = vld [vmem:[#allocation5 + $0x38] sm:$0xff] }
  0x1b   :  { %223 = vmatpush.msra.mxu2 %v202_v6 }
  0x1c   :  { %v96_v15 = vadd.f32 %v313_v4, %v95_v10 }
  0x1e   :  { %v460_v20 = vsel %vm97_vm1, %v313_v4, %v96_v15 }
  0x8f   :  { %v83_v7 = vpop.f32.mrf.mxu0 }
  0x90   :  { %v86_v8 = vrot.slane %v83_v7, 4  ;;  %v100_v9 = vmul.f32 %v83_v7, %v83_v7 }
  0x92   :  { %v87_v11 = vadd.f32 %v86_v8, %v83_v7  ;;  %v101_v12 = vrot.slane %v100_v9, 4  ;;  %v201_v8 = vld [vmem:[#allocation5 + $0x30] sm:$0xff] }
  0x93   :  { %224 = vmatpush.msra.mxu2 %v201_v8 }
  0x94   :  { %v88_v13 = vrot.slane %v87_v11, 2  ;;  %v102_v14 = vadd.f32 %v101_v12, %v100_v9 }
  0x96   :  { %v89_v16 = vadd.f32 %v88_v13, %v87_v11  ;;  %v103_v17 = vrot.slane %v102_v14, 2 }
  0x98   :  { %v90_v18 = vrot.slane %v89_v16, 1  ;;  %v104_v19 = vadd.f32 %v103_v17, %v102_v14 }
  0x9a   :  { %v91_v21 = vadd.f32 %v90_v18, %v89_v16  ;;  %v105_v22 = vrot.slane %v104_v19, 1 }
  0x9c   :  { %v99_v23 = vmul.f32 %v460_v20, %v91_v21  ;;  %v106_v24 = vadd.f32 %v105_v22, %v104_v19 }
  0x9e   :  { %v107_v27 = vmul.f32 %v106_v24, %v460_v20  ;;  %v108_v28 = vmul.f32 %v99_v23, %v99_v23 }
  0xa0   :  { %v109_v30 = vsub.f32 %v107_v27, %v108_v28  ;;  %v205_v28 = vperm.slane %v464_v39, 4 }
  0xa2   :  { %v110_v32 = vmax.f32 %v109_v30, 0.0 }
  0xa4   :  { %v111_v33 = vadd.f32 1e-05, %v110_v32 }
  0xa6   :  { %314 = vrsqrt.f32 %v111_v33  ;;  %vm118_vm3 = vweird.f32 %v111_v33 }
  0xac   :  { %v315_v34 = vpop.eup %314 }
  0xad   :  { %v113_v35 = vmul.f32 %v315_v34, %v111_v33  ;;  %vm119_vm2 = vweird.f32 %v315_v34 }
  0xae   :  { %vm120_vm4 = vmor %vm118_vm3, %vm119_vm2 }
  0xaf   :  { %v114_v36 = vmul.f32 %v315_v34, %v113_v35 }
  0xb1   :  { %v115_v37 = vmul.f32 0.5, %v114_v36 }
  0xb3   :  { %v116_v38 = vsub.f32 1.5, %v115_v37 }
  0xb5   :  { %v117_v40 = vmul.f32 %v315_v34, %v116_v38 }
  0xb7   :  { %v121_v41 = vsel %vm120_vm4, %v315_v34, %v117_v40 }
  0xb8   :  { %v122_v42 = vmul.f32 %v121_v41, %v464_v39 }
  0xba   :  { %v123_v43 = vmul.f32 %v122_v42, %v99_v23  ;;  %v128_v44 = vperm.slane %v122_v42, 0 }
  0xbc   :  { %v125_v45 = vrot.slane %v123_v43, 7  ;;  %v129_v47 = vmul.f32 %v128_v44, %v83_v7 }
  0xbe   :  { %v127_v46 = vsub.f32 %v464_v39, %v125_v45 }
  0xc0   :  { %v130_v48 = vperm.slane %v127_v46, 1 }
  0xc2   :  { %v131_v49 = vadd.f32 %v130_v48, %v129_v47 }
  0xc4   :  { %v132_v50 = vmax.f32 %v131_v49, 0.0 }
  0xc6   :  { %303 = vmatmul.msk.f32.vlgmr.msra.gmra.mxu1 %vm137_vm5, %v132_v50 }
 0x143   :  { %v158_v51 = vpop.f32.mrf.mxu1 }
 0x144   :  { %v161_v52 = vrot.slane %v158_v51, 4  ;;  %v168_v53 = vmul.f32 %v158_v51, %v158_v51 }
 0x146   :  { %v162_v54 = vadd.f32 %v161_v52, %v158_v51  ;;  %v169_v55 = vrot.slane %v168_v53, 4 }
 0x148   :  { %v163_v56 = vrot.slane %v162_v54, 2  ;;  %v170_v57 = vadd.f32 %v169_v55, %v168_v53 }
 0x14a   :  { %v164_v58 = vadd.f32 %v163_v56, %v162_v54  ;;  %v171_v59 = vrot.slane %v170_v57, 2 }
 0x14c   :  { %v165_v60 = vrot.slane %v164_v58, 1  ;;  %v172_v61 = vadd.f32 %v171_v59, %v170_v57 }
 0x14e   :  { %v166_v62 = vadd.f32 %v165_v60, %v164_v58  ;;  %v173_v63 = vrot.slane %v172_v61, 1 }
 0x150   :  { %v167_v0 = vmul.f32 %v166_v62, %v460_v20  ;;  %v174_v1 = vadd.f32 %v173_v63, %v172_v61 }
 0x152   :  { %v175_v4 = vmul.f32 %v174_v1, %v460_v20  ;;  %v176_v5 = vmul.f32 %v167_v0, %v167_v0 }
 0x154   :  { %v177_v7 = vsub.f32 %v175_v4, %v176_v5 }
 0x156   :  { %v178_v9 = vmax.f32 %v177_v7, 0.0 }
 0x158   :  { %v179_v10 = vadd.f32 1e-05, %v178_v9 }
 0x15a   :  { %316 = vrsqrt.f32 %v179_v10  ;;  %vm186_vm7 = vweird.f32 %v179_v10 }
 0x160   :  { %v317_v11 = vpop.eup %316 }
 0x161   :  { %v181_v12 = vmul.f32 %v317_v11, %v179_v10  ;;  %vm187_vm6 = vweird.f32 %v317_v11 }
 0x162   :  { %vm188_vm8 = vmor %vm186_vm7, %vm187_vm6 }
 0x163   :  { %v182_v13 = vmul.f32 %v317_v11, %v181_v12 }
 0x165   :  { %v183_v14 = vmul.f32 0.5, %v182_v13 }
 0x167   :  { %v184_v15 = vsub.f32 1.5, %v183_v14 }
 0x169   :  { %v185_v16 = vmul.f32 %v317_v11, %v184_v15 }
 0x16b   :  { %v189_v17 = vsel %vm188_vm8, %v317_v11, %v185_v16 }
 0x16c   :  { %v190_v18 = vmul.f32 %v189_v17, %v464_v39 }
 0x16e   :  { %v191_v19 = vmul.f32 %v190_v18, %v167_v0  ;;  %v196_v21 = vperm.slane %v190_v18, 2 }
 0x170   :  { %v193_v22 = vrot.slane %v191_v19, 7  ;;  %v197_v24 = vmul.f32 %v196_v21, %v158_v51 }
 0x172   :  { %v195_v23 = vsub.f32 %v464_v39, %v193_v22 }
 0x174   :  { %v198_v25 = vperm.slane %v195_v23, 3 }
 0x176   :  { %v199_v26 = vadd.f32 %v198_v25, %v197_v24 }
 0x178   :  { %v200_v27 = vmax.f32 %v199_v26, 0.0 }
 0x17a   :  { %304 = vmatmul.msk.f32.vlgmr.msra.gmra.mxu2 %vm137_vm5, %v200_v27 }
 0x1fd   :  { %v226_v29 = vpop.f32.mrf.mxu2 }
 0x1fe   :  { %v227_v30 = vadd.f32 %v226_v29, %v205_v28 }
 0x200   :  { %v229_v31 = vmul.f32 %v227_v30, %v227_v30 }
 0x202   :  { %230 = vadd.xlane.f32.xlu0 %v229_v31 }
 0x275   :  { %v231_v32 = vpop.xlane.xlu0 %230 }
 0x276   :  { %v232_v33 = vmax.f32 %v231_v32, 1e-24 }
 0x278   :  { %318 = vrsqrt.f32 %v232_v33  ;;  %vm239_vm10 = vweird.f32 %v232_v33 }
 0x27e   :  { %v319_v34 = vpop.eup %318 }
 0x27f   :  { %v234_v35 = vmul.f32 %v319_v34, %v232_v33  ;;  %vm240_vm9 = vweird.f32 %v319_v34 }
 0x280   :  { %vm241_vm11 = vmor %vm239_vm10, %vm240_vm9 }
 0x281   :  { %v235_v36 = vmul.f32 %v319_v34, %v234_v35 }
 0x283   :  { %v236_v37 = vmul.f32 0.5, %v235_v36 }
 0x285   :  { %v237_v38 = vsub.f32 1.5, %v236_v37 }
 0x287   :  { %v238_v40 = vmul.f32 %v319_v34, %v237_v38 }
 0x289   :  { %v242_v41 = vsel %vm241_vm11, %v319_v34, %v238_v40 }
 0x28a   :  { %v243_v42 = vmul.f32 %v242_v41, %v227_v30 }
 0x28c   :  { %v244_v43 = vrot.slane %v243_v42, 4  ;;  %v251_v44 = vmul.f32 %v243_v42, %v243_v42 }
 0x28e   :  { %v245_v45 = vadd.f32 %v244_v43, %v243_v42  ;;  %v252_v46 = vrot.slane %v251_v44, 4 }
 0x290   :  { %v253_v47 = vadd.f32 %v252_v46, %v251_v44  ;;  %v246_v48 = vrot.slane %v245_v45, 2 }
 0x292   :  { %v254_v49 = vrot.slane %v253_v47, 2  ;;  %v247_v50 = vadd.f32 %v246_v48, %v245_v45 }
 0x294   :  { %v255_v51 = vadd.f32 %v254_v49, %v253_v47  ;;  %v248_v52 = vrot.slane %v247_v50, 1 }
 0x296   :  { %v249_v53 = vadd.f32 %v248_v52, %v247_v50  ;;  %v256_v54 = vrot.slane %v255_v51, 1 }
 0x298   :  { %v250_v55 = vmul.f32 %v249_v53, %v460_v20  ;;  %v257_v56 = vadd.f32 %v256_v54, %v255_v51 }
 0x29a   :  { %v258_v57 = vmul.f32 %v257_v56, %v460_v20  ;;  %v259_v58 = vmul.f32 %v250_v55, %v250_v55 }
 0x29c   :  { %v260_v59 = vsub.f32 %v258_v57, %v259_v58 }
 0x29e   :  { %v261_v60 = vmax.f32 %v260_v59, 0.0 }
 0x2a0   :  { %v262_v61 = vadd.f32 1e-05, %v261_v60 }
 0x2a2   :  { %320 = vrsqrt.f32 %v262_v61  ;;  %vm269_vm13 = vweird.f32 %v262_v61 }
 0x2a8   :  { %v321_v62 = vpop.eup %320 }
 0x2a9   :  { %v264_v63 = vmul.f32 %v321_v62, %v262_v61  ;;  %vm270_vm12 = vweird.f32 %v321_v62 }
 0x2aa   :  { %vm271_vm14 = vmor %vm269_vm13, %vm270_vm12 }
 0x2ab   :  { %v265_v0 = vmul.f32 %v321_v62, %v264_v63 }
 0x2ad   :  { %v266_v1 = vmul.f32 0.5, %v265_v0 }
 0x2af   :  { %v267_v2 = vsub.f32 1.5, %v266_v1 }
 0x2b1   :  { %v268_v3 = vmul.f32 %v321_v62, %v267_v2 }
 0x2b3   :  { %v272_v4 = vsel %vm271_vm14, %v321_v62, %v268_v3 }
 0x2b4   :  { %v273_v5 = vmul.f32 %v272_v4, %v464_v39 }
 0x2b6   :  { %v274_v6 = vmul.f32 %v273_v5, %v250_v55  ;;  %v279_v20 = vperm.slane %v273_v5, 5 }
 0x2b8   :  { %v276_v7 = vrot.slane %v274_v6, 7  ;;  %v280_v9 = vmul.f32 %v279_v20, %v243_v42 }
 0x2ba   :  { %v278_v8 = vsub.f32 %v464_v39, %v276_v7 }
 0x2bc   :  { %v281_v10 = vperm.slane %v278_v8, 6 }
 0x2be   :  { %v282_v11 = vadd.f32 %v281_v10, %v280_v9 }
 0x2c0   :  { %283 = vst [vmem:[#allocation8] sm:$0xff] %v282_v11 }
 0x2c1   :  { %294 = dma.vmem_to_hbm [thread:$0]  %s290_s2, 128, %s292_s30, [#allocation4]  }
 0x2c2   :  { %422 = dma.done.wait [#allocation4], 128  }
 0x2c3   :  { %423 = vsyncadd [#allocation4], 4294967168 }
 0x2c4   :  { %299 = vsyncpa [#allocation3], 1 }
 0x2c5   :  { %300 = vsyncpa [#allocation6], 1 }
 0x2c6   :  { %301 = vsyncpa [#allocation4], 1 }

</bundles_post_ra>
